<compile_context>
chip_gen: v5e
topology: v5e:2x2
jax: 0.10.0
libtpu: 0.0.40
codegen_flags: <defaults>
</compile_context>

<pallas_src>
import jax
import jax.numpy as jnp
import numpy as np
from jax.experimental import pallas as pl
from jax.experimental.pallas import tpu as pltpu

# synthetic tokenizer constants (deterministic stand-ins for '~</w>' and "'</w>")
TILDE_ID = 3
APOS_ID = 5


def _gec_voc_kernel(widx_ref, mask_ref, rhs_ref, w_ref, b_ref,
                    out_ref, maskw_ref):
    """One (v-tile, batch) grid step.

    widx_ref : (1, S, 1)   int32  word index per token
    mask_ref : (1, S, 1)   f32    attention mask (0/1)
    rhs_ref  : (1, S, H+1) bf16   [encoder hidden | ones]  (ones -> counts)
    w_ref    : (H, tv)     bf16   fused [w_tag | w_voc] tile (zero padded)
    b_ref    : (1, tv)     f32    fused [b_tag | b_voc] tile (zero padded)
    out_ref  : (1, S, tv)  f32    fused tag|voc logits tile (lane dense)
    maskw_ref: (1, 1, S)   f32    word-collated attention mask (lane dense)
    """
    widx = widx_ref[0]                       # (S, 1) int32
    mask = mask_ref[0]                       # (S, 1) f32
    rhs = rhs_ref[0]                         # (S, H+1) bf16
    S = widx.shape[0]
    H = rhs.shape[1] - 1

    # Membership matrix: member[t, w] = True iff token t belongs to word slot w.
    word_iota = jax.lax.broadcasted_iota(jnp.int32, (S, S), 1)
    member = widx == word_iota               # (S_tok, S_word) bool
    M = member.astype(jnp.bfloat16)          # exact 0/1 in bf16

    # Fused collate: ONE MXU pass gives [segment_sums | segment_counts].
    G = jax.lax.dot_general(M, rhs, (((0,), (0,)), ((), ())),
                            preferred_element_type=jnp.float32)   # (S_w, H+1)
    counts = G[:, H:H + 1]                                        # (S_w, 1)
    inv = pl.reciprocal(jnp.maximum(counts, 1.0), approx=True)    # EUP slot
    h_w = G[:, :H] * inv                                          # mean collate

    # Fused tag|voc head: full-width MXU matmul + single fused bias add.
    out = jnp.dot(h_w.astype(jnp.bfloat16), w_ref[...],
                  preferred_element_type=jnp.float32) + b_ref[...]
    out_ref[0] = out                                              # lane dense

    # word_collate(attention_mask, 'max'): masked sublane max -> (1, S_w) row.
    # Written every grid step (identical value per v tile) so output
    # double-buffering stays correct; the (1, S) store is negligible.
    masked = jnp.where(member, mask, 0.0)                         # (S_tok, S_w)
    maskw_ref[0] = jnp.max(masked, axis=0, keepdims=True)


def _generate_word_index(input_ids, is_eow_table):
    """Mirror of GecBertModel._generate_word_index with a synthetic
    end-of-word lookup table.
    # TODO(synk): tokenizer._is_end_of_word is not reproducible in-script;
    # replaced by a deterministic per-token-id lookup table."""
    word_ends = is_eow_table[input_ids].astype(jnp.int32)              # (B, S)
    tildes = input_ids == TILDE_ID
    comb = tildes[:, 1:-1] | tildes[:, 2:] | tildes[:, :-2]
    word_ends = word_ends.at[:, 1:-1].set(
        jnp.where(comb, 0, word_ends[:, 1:-1]))
    alone_apos = (input_ids == APOS_ID)[:, 1:]
    word_ends = word_ends.at[:, :-1].set(
        jnp.where(alone_apos, 0, word_ends[:, :-1]))
    word_ends = jnp.roll(word_ends, 1, axis=-1)
    word_ends = word_ends.at[:, 0].set(0)
    return jnp.cumsum(word_ends, axis=-1)                              # (B, S)


def gec_bert_voc_forward(input_ids, attention_mask, params, *, tv_max=512):
    B, S = input_ids.shape
    H = params["emb"].shape[1]
    T = params["w_tag"].shape[1]
    V = params["w_voc"].shape[1]

    # TODO(synk): pretrained FlaubertModel encoder cannot be reproduced here;
    # a deterministic embedding-lookup stand-in provides last_hidden_state.
    hidden = params["emb"][input_ids].astype(jnp.float32)              # (B, S, H)

    word_index = _generate_word_index(input_ids, params["is_eow"])     # (B, S)
    widx = word_index.astype(jnp.int32)[..., None]                     # (B, S, 1)
    mask3 = attention_mask.astype(jnp.float32)[..., None]              # (B, S, 1)

    # Fused collate RHS: [hidden | ones] in bf16 (ones column yields counts).
    rhs = jnp.concatenate(
        [hidden, jnp.ones((B, S, 1), jnp.float32)], axis=-1
    ).astype(jnp.bfloat16)                                             # (B, S, H+1)

    # Fused + padded head weights: columns padded to a multiple of the V tile
    # so every output store is full-lane-width.
    P0 = T + V
    tv = min(tv_max, ((P0 + 127) // 128) * 128)                        # lane tile
    NV = (P0 + tv - 1) // tv
    Ppad = NV * tv
    w_fused = jnp.concatenate([params["w_tag"], params["w_voc"]], axis=1)
    b_fused = jnp.concatenate([params["b_tag"], params["b_voc"]], axis=1)
    w_fused = jnp.pad(w_fused, ((0, 0), (0, Ppad - P0))).astype(jnp.bfloat16)
    b_fused = jnp.pad(b_fused, ((0, 0), (0, Ppad - P0))).astype(jnp.float32)

    # Grid: V tiles outermost (weight tile DMA'd once, reused across batch),
    # batch innermost; both axes parallel (megacore / v7x 2-TC sharding).
    grid_spec = pltpu.PrefetchScalarGridSpec(
        num_scalar_prefetch=0,
        grid=(NV, B),
        in_specs=[
            pl.BlockSpec((1, S, 1), lambda v, b: (b, 0, 0)),       # word index
            pl.BlockSpec((1, S, 1), lambda v, b: (b, 0, 0)),       # attn mask
            pl.BlockSpec((1, S, H + 1), lambda v, b: (b, 0, 0)),   # [hidden|1]
            pl.BlockSpec((H, tv), lambda v, b: (0, v)),            # W tile
            pl.BlockSpec((1, tv), lambda v, b: (0, v)),            # bias tile
        ],
        out_specs=[
            pl.BlockSpec((1, S, tv), lambda v, b: (b, 0, v)),      # tag|voc
            pl.BlockSpec((1, 1, S), lambda v, b: (b, 0, 0)),       # mask_w row
        ],
    )

    fused_out, mask_w3 = pl.pallas_call(
        _gec_voc_kernel,
        out_shape=(
            jax.ShapeDtypeStruct((B, S, Ppad), jnp.float32),
            jax.ShapeDtypeStruct((B, 1, S), jnp.float32),
        ),
        grid_spec=grid_spec,
        compiler_params=pltpu.CompilerParams(
            dimension_semantics=("parallel", "parallel"),
            vmem_limit_bytes=48 * 1024 * 1024),
    )(widx, mask3, rhs, w_fused, b_fused)

    tag_out = fused_out[..., :T]
    voc_out = fused_out[..., T:T + V]

    # attention_mask[:, 1:-1] = attention_mask_larger[:, 2:]  (rest zeros)
    mask_larger = mask_w3[:, 0, :]                                     # (B, S)
    att = jnp.zeros_like(mask_larger)
    att = att.at[:, 1:-1].set(mask_larger[:, 2:])

    # dropout p=0.0 by default -> no dropout layer (matches module default)
    return {"tag_out": tag_out, "voc_out": voc_out, "attention_mask": att}


def _reference(input_ids, attention_mask, params):
    """Pure-JAX f32 reference of the same forward semantics, for verification."""
    hidden = params["emb"][input_ids].astype(jnp.float32)
    word_index = _generate_word_index(input_ids, params["is_eow"])
    B, S, H = hidden.shape
    oh = (word_index[..., None] == jnp.arange(S)[None, None, :]).astype(jnp.float32)
    counts = oh.sum(axis=1)                                            # (B, S_w)
    sums = jnp.einsum("btw,bth->bwh", oh, hidden)
    h_w = sums / jnp.maximum(counts, 1.0)[..., None]
    tag = h_w @ params["w_tag"] + params["b_tag"][0]
    voc = h_w @ params["w_voc"] + params["b_voc"][0]
    msum = jnp.einsum("btw,bt->bw", oh, attention_mask.astype(jnp.float32))
    mask_w = (msum > 0.0).astype(jnp.float32)
    att = jnp.zeros_like(mask_w)
    att = att.at[:, 1:-1].set(mask_w[:, 2:])
    return tag, voc, att


if __name__ == "__main__":
    key = jax.random.PRNGKey(0)
    B, S, H = 2, 8, 32
    NUM_TAG, NUM_VOC, VOCAB = 16, 24, 50

    k_emb, k_wt, k_bt, k_wv, k_bv, k_eow, k_ids = jax.random.split(key, 7)
    params = {
        "emb": jax.random.normal(k_emb, (VOCAB, H), jnp.float32) * 0.1,
        "w_tag": jax.random.normal(k_wt, (H, NUM_TAG), jnp.float32) * 0.1,
        "b_tag": jax.random.normal(k_bt, (1, NUM_TAG), jnp.float32) * 0.1,
        "w_voc": jax.random.normal(k_wv, (H, NUM_VOC), jnp.float32) * 0.1,
        "b_voc": jax.random.normal(k_bv, (1, NUM_VOC), jnp.float32) * 0.1,
        # TODO(synk): tokenizer._is_end_of_word replaced by a synthetic table.
        "is_eow": jax.random.bernoulli(k_eow, 0.5, (VOCAB,)).astype(jnp.int32),
    }

    input_ids = jax.random.randint(k_ids, (B, S), 0, VOCAB, dtype=jnp.int32)
    attention_mask = jnp.ones((B, S), jnp.int32).at[1, -2:].set(0)

    out = gec_bert_voc_forward(input_ids, attention_mask, params)
    out = jax.block_until_ready(out)

    ref_tag, ref_voc, ref_att = _reference(input_ids, attention_mask, params)
    # bf16 MXU operands + approx reciprocal -> loosened tolerance vs f32 ref.
    np.testing.assert_allclose(np.asarray(out["tag_out"]), np.asarray(ref_tag),
                               rtol=2e-2, atol=2e-2)
    np.testing.assert_allclose(np.asarray(out["voc_out"]), np.asarray(ref_voc),
                               rtol=2e-2, atol=2e-2)
    np.testing.assert_allclose(np.asarray(out["attention_mask"]),
                               np.asarray(ref_att), rtol=1e-6, atol=1e-6)

    print("KERNEL_OK")
</pallas_src>

<mosaic_0001>
module attributes {stable_mosaic.version = 11 : i64} {
  func.func @_gec_voc_kernel(%arg0: i32, %arg1: i32, %arg2: memref<1x8x1xi32, #tpu.memory_space<vmem>>, %arg3: memref<1x8x1xf32, #tpu.memory_space<vmem>>, %arg4: memref<1x8x33xbf16, #tpu.memory_space<vmem>>, %arg5: memref<32x128xbf16, #tpu.memory_space<vmem>>, %arg6: memref<1x128xf32, #tpu.memory_space<vmem>>, %arg7: memref<1x8x128xf32, #tpu.memory_space<vmem>>, %arg8: memref<1x1x8xf32, #tpu.memory_space<vmem>>) attributes {dimension_semantics = [#tpu.dimension_semantics<parallel>, #tpu.dimension_semantics<parallel>], iteration_bounds = array<i64: 1, 2>, scalar_prefetch = 0 : i64, scratch_operands = 0 : i64, tpu.core_type = #tpu.core_type<tc>, window_params = [{transform_indices = @transform_0, window_bounds = array<i64: 1, 8, 1>}, {transform_indices = @transform_1, window_bounds = array<i64: 1, 8, 1>}, {transform_indices = @transform_2, window_bounds = array<i64: 1, 8, 33>}, {transform_indices = @transform_3, window_bounds = array<i64: 32, 128>}, {transform_indices = @transform_4, window_bounds = array<i64: 1, 128>}, {transform_indices = @transform_5, window_bounds = array<i64: 1, 8, 128>}, {transform_indices = @transform_6, window_bounds = array<i64: 1, 1, 8>}]} {
    %c0 = arith.constant 0 : index
    %c0_0 = arith.constant 0 : index
    %c0_1 = arith.constant 0 : index
    %0 = vector.load %arg2[%c0, %c0_0, %c0_1] : memref<1x8x1xi32, #tpu.memory_space<vmem>>, vector<1x8x1xi32>
    %1 = vector.shape_cast %0 : vector<1x8x1xi32> to vector<8x1xi32>
    %c0_2 = arith.constant 0 : index
    %c0_3 = arith.constant 0 : index
    %c0_4 = arith.constant 0 : index
    %2 = vector.load %arg3[%c0_2, %c0_3, %c0_4] : memref<1x8x1xf32, #tpu.memory_space<vmem>>, vector<1x8x1xf32>
    %3 = vector.shape_cast %2 : vector<1x8x1xf32> to vector<8x1xf32>
    %c0_5 = arith.constant 0 : index
    %c0_6 = arith.constant 0 : index
    %c0_7 = arith.constant 0 : index
    %4 = vector.load %arg4[%c0_5, %c0_6, %c0_7] : memref<1x8x33xbf16, #tpu.memory_space<vmem>>, vector<1x8x33xbf16>
    %5 = vector.shape_cast %4 : vector<1x8x33xbf16> to vector<8x33xbf16>
    %6 = tpu.iota {dimensions = array<i32: 1>} : vector<8x8xi32>
    %7 = vector.broadcast %1 : vector<8x1xi32> to vector<8x8xi32>
    %8 = arith.cmpi eq, %7, %6 : vector<8x8xi32>
    %9 = arith.extui %8 : vector<8x8xi1> to vector<8x8xi32>
    %10 = arith.sitofp %9 : vector<8x8xi32> to vector<8x8xf32>
    %11 = arith.truncf %10 : vector<8x8xf32> to vector<8x8xbf16>
    %cst = arith.constant dense<0.000000e+00> : vector<8x33xf32>
    %12 = tpu.matmul %11, %5, %cst {dimension_numbers = #tpu.dot_dimension_numbers<[0], [0], [1], [1], [0, 1, 1, 1], [], []>} : vector<8x8xbf16>, vector<8x33xbf16>, vector<8x33xf32> -> vector<8x33xf32>
    %13 = vector.extract_strided_slice %12 {offsets = [0, 32], sizes = [8, 1], strides = [1, 1]} : vector<8x33xf32> to vector<8x1xf32>
    %cst_8 = arith.constant 1.000000e+00 : f32
    %14 = vector.broadcast %cst_8 : f32 to vector<8x1xf32>
    %15 = arith.maximumf %13, %14 : vector<8x1xf32>
    %16 = tpu.reciprocal %15 {approx = true} : vector<8x1xf32> -> vector<8x1xf32>
    %17 = vector.extract_strided_slice %12 {offsets = [0, 0], sizes = [8, 32], strides = [1, 1]} : vector<8x33xf32> to vector<8x32xf32>
    %18 = vector.broadcast %16 : vector<8x1xf32> to vector<8x32xf32>
    %19 = arith.mulf %17, %18 : vector<8x32xf32>
    %20 = arith.truncf %19 : vector<8x32xf32> to vector<8x32xbf16>
    %c0_9 = arith.constant 0 : index
    %c0_10 = arith.constant 0 : index
    %21 = vector.load %arg5[%c0_9, %c0_10] : memref<32x128xbf16, #tpu.memory_space<vmem>>, vector<32x128xbf16>
    %cst_11 = arith.constant dense<0.000000e+00> : vector<8x128xf32>
    %22 = tpu.matmul %20, %21, %cst_11 {dimension_numbers = #tpu.dot_dimension_numbers<[1], [0], [0], [1], [0, 0, 1, 1], [], []>} : vector<8x32xbf16>, vector<32x128xbf16>, vector<8x128xf32> -> vector<8x128xf32>
    %c0_12 = arith.constant 0 : index
    %c0_13 = arith.constant 0 : index
    %23 = vector.load %arg6[%c0_12, %c0_13] : memref<1x128xf32, #tpu.memory_space<vmem>>, vector<1x128xf32>
    %24 = vector.broadcast %23 : vector<1x128xf32> to vector<8x128xf32>
    %25 = arith.addf %22, %24 : vector<8x128xf32>
    %c0_14 = arith.constant 0 : index
    %c0_15 = arith.constant 0 : index
    %c0_16 = arith.constant 0 : index
    %26 = vector.load %arg7[%c0_14, %c0_15, %c0_16] : memref<1x8x128xf32, #tpu.memory_space<vmem>>, vector<1x8x128xf32>
    %27 = vector.shape_cast %26 : vector<1x8x128xf32> to vector<8x128xf32>
    %28 = vector.shape_cast %25 : vector<8x128xf32> to vector<1x8x128xf32>
    tpu.vector_store %arg7[%c0_14, %c0_15, %c0_16], %28 {strides = array<i32>} : memref<1x8x128xf32, #tpu.memory_space<vmem>>, vector<1x8x128xf32>,
    %cst_17 = arith.constant 0.000000e+00 : f32
    %29 = vector.shape_cast %3 : vector<8x1xf32> to vector<8x1xf32>
    %30 = vector.broadcast %29 : vector<8x1xf32> to vector<8x8xf32>
    %31 = vector.broadcast %cst_17 : f32 to vector<8x8xf32>
    %32 = arith.select %8, %30, %31 : vector<8x8xi1>, vector<8x8xf32>
    %cst_18 = arith.constant dense<0xFF800000> : vector<8xf32>
    %33 = vector.multi_reduction <maximumf>, %32, %cst_18 [0] : vector<8x8xf32> to vector<8xf32>
    %34 = vector.shape_cast %33 : vector<8xf32> to vector<1x8xf32>
    %c0_19 = arith.constant 0 : index
    %c0_20 = arith.constant 0 : index
    %c0_21 = arith.constant 0 : index
    %35 = vector.load %arg8[%c0_19, %c0_20, %c0_21] : memref<1x1x8xf32, #tpu.memory_space<vmem>>, vector<1x1x8xf32>
    %36 = vector.shape_cast %35 : vector<1x1x8xf32> to vector<1x8xf32>
    %37 = vector.shape_cast %34 : vector<1x8xf32> to vector<1x1x8xf32>
    tpu.vector_store %arg8[%c0_19, %c0_20, %c0_21], %37 {strides = array<i32>} : memref<1x1x8xf32, #tpu.memory_space<vmem>>, vector<1x1x8xf32>,
    return
  }
  func.func @transform_0(%arg0: i32, %arg1: i32) -> (i32, i32, i32) {
    %c0_i32 = arith.constant 0 : i32
    %c0_i32_0 = arith.constant 0 : i32
    %c0_i32_1 = arith.constant 0 : i32
    return %arg1, %c0_i32, %c0_i32_0 : i32, i32, i32
  }
  func.func @transform_1(%arg0: i32, %arg1: i32) -> (i32, i32, i32) {
    %c0_i32 = arith.constant 0 : i32
    %c0_i32_0 = arith.constant 0 : i32
    %c0_i32_1 = arith.constant 0 : i32
    return %arg1, %c0_i32, %c0_i32_0 : i32, i32, i32
  }
  func.func @transform_2(%arg0: i32, %arg1: i32) -> (i32, i32, i32) {
    %c0_i32 = arith.constant 0 : i32
    %c0_i32_0 = arith.constant 0 : i32
    %c0_i32_1 = arith.constant 0 : i32
    return %arg1, %c0_i32, %c0_i32_0 : i32, i32, i32
  }
  func.func @transform_3(%arg0: i32, %arg1: i32) -> (i32, i32) {
    %c0_i32 = arith.constant 0 : i32
    %c0_i32_0 = arith.constant 0 : i32
    return %c0_i32, %arg0 : i32, i32
  }
  func.func @transform_4(%arg0: i32, %arg1: i32) -> (i32, i32) {
    %c0_i32 = arith.constant 0 : i32
    %c0_i32_0 = arith.constant 0 : i32
    return %c0_i32, %arg0 : i32, i32
  }
  func.func @transform_5(%arg0: i32, %arg1: i32) -> (i32, i32, i32) {
    %c0_i32 = arith.constant 0 : i32
    %c0_i32_0 = arith.constant 0 : i32
    return %arg1, %c0_i32, %arg0 : i32, i32, i32
  }
  func.func @transform_6(%arg0: i32, %arg1: i32) -> (i32, i32, i32) {
    %c0_i32 = arith.constant 0 : i32
    %c0_i32_0 = arith.constant 0 : i32
    %c0_i32_1 = arith.constant 0 : i32
    return %arg1, %c0_i32, %c0_i32_0 : i32, i32, i32
  }
}

</mosaic_0001>

<bundles_post_ra>
// kernel: tpu_custom_call.1
= control target key start
LH: loop header
LB: loop body
LE: loop exit
PB: predicated region body
PF: predicated region fallthrough
CT: control target
= control target key end

     0   :  { %s1020_s0 = inlined_call_operand.vmem [shape: s32[2,8,1], index: 0, kind: input, shape index: {}]   ;;  %s1021_s1 = inlined_call_operand.vmem [shape: f32[2,8,1], index: 1, kind: input, shape index: {}]   ;;  %s1022_s2 = inlined_call_operand.vmem [shape: bf16[2,8,33], index: 2, kind: input, shape index: {}]   ;;  %s1023_s3 = inlined_call_operand.vmem [shape: bf16[32,128], index: 3, kind: input, shape index: {}]   ;;  %s1024_s4 = inlined_call_operand.vmem [shape: f32[1,128], index: 4, kind: input, shape index: {}]   ;;  %s1025_s5 = inlined_call_operand.hbm [shape: f32[2,8,128], index: 5, kind: output, shape index: {0}]   ;;  %s1026_s6 = inlined_call_operand.hbm [shape: f32[2,1,8], index: 6, kind: output, shape index: {1}]  }
   0x1   :  { %1027 = sst [smem:[#allocation8_spill]] %s1020_s0 }
   0x2   :  { %12 = vsyncpa [#allocation3], 0 }
   0x3   :  { %14 = vsyncpa [#allocation3 + $0x1], 0 }
   0x4   :  { %15 = vsyncpa [#allocation5], 0 }
   0x5   :  { %17 = vsyncpa [#allocation5 + $0x1], 0  ;;  %s876_s21 = smov 0   ;;  %s878_s22 = smov 0  }
   0x6   :  { %s880_s23 = smov 0   ;;  %s882_s24 = smov 0  }
   0x7   :  { %s884_s25 = smov 0   ;;  %s886_s26 = smov 0  }
   0x8 LB: > { %s629_s27 = sadd.s32 4294967295, %s836_s26   ;;  %s630_s28 = sadd.s32 4294967294, %s836_s26   ;;  %s836_s26 = sphi %s886_s26, %s23_s26   ;;  %s832_s25 = sphi %s884_s25, %s1035_s25   ;;  %s828_s24 = sphi %s882_s24, %s1034_s24   ;;  %s824_s23 = sphi %s880_s23, %s1033_s23   ;;  %s820_s22 = sphi %s878_s22, %s1032_s22   ;;  %s816_s21 = sphi %s876_s21, %s1031_s21  }
   0x9   : > { %s32_s29 = sadd.s32 1, %s832_s25  ;;  %s174_s30 = sadd.s32 1, %s824_s23 }
   0xa   : > { %p33_p0 = scmp.ge.s32.totalorder %s32_s29, 2  ;;  %p184_p1 = scmp.ne.s32.totalorder %s824_s23, %s820_s22 }
   0xb   : > { %p185_p2 = scmp.eq.s32.totalorder %s629_s27, 1  ;;  %p190_p3 = scmp.ne.s32.totalorder %s820_s22, %s816_s21 }
   0xc   : > { %s1037_s29 = smov (%p33_p0, %s32_s29), 0  ;;  %p191_p5 = scmp.eq.s32.totalorder %s630_s28, 1 }
   0xd   : > { %p916_p4 = por %p185_p2, %p184_p1  ;;  %s169_s8 = ssub.s32 %s832_s25, %s1037_s29 }
   0xe   : > { %p635_p6 = scmp.ge.s32.totalorder %s836_s26, 1  ;;  %p172_p7 = scmp.eq.s32.totalorder %s169_s8, 0 }
   0xf   : > { %p923_p8 = por %p191_p5, %p190_p3  ;;  %p269_p9 = scmp.lt.s32.totalorder %s836_s26, 3 }
  0x10   : > { %s929_s10 = scalar_select %p172_p7, %s824_s23, %s174_s30  }
  0x11   : > { %p270_p10 = pnand %p635_p6, %p269_p9 }
  0x12   : > { %p317_p11 = scmp.lt.s32.totalorder (!%p270_p10), %s828_s24, 1  ;;  %s1030_s0 = sld [smem:[#allocation8_spill]] (!%p270_p10) }
  0x13   : > { %273 = sbr.rel (%p270_p10) target bundleno = 709 (0x2c5), region = 40  ;;  %s746_s13 = scalar_lea.hbm (!%p270_p10), %s1026_s6, 2 }
  0x18   : > { %v838_v0 = vmov 0   ;;  %s933_s11 = scalar_select %p317_p11, %s828_s24, 1  ;;  %vm369_vm0 = vcmask 1043456   ;;  %v340_v4 = vlaneseq  ;;  %v839_v7 = vmov 0.0   ;;  %v656_v12 = vld [vmem:[%s1023_s3 + $0x8] sm:$0xff]  ;;  %v655_v18 = vld [vmem:[%s1023_s3] sm:$0xff] }
  0x19   : > { %720 = vset.pattern.permute.xlu0 %v838_v0  ;;  %vm365_vm2 = vcmask 64512   ;;  %v840_v11 = vmov 32   ;;  %425 = vmatpush.bf16.msra.mxu1 %v656_v12  ;;  %vm415_vm3 = vcmask 261120   ;;  %vm446_vm4 = vcmask 57344  }
  0x1a   : > { %s637_s12 = sshll.u32 %s933_s11, 3  ;;  %s639_s16 = sshll.u32 %s933_s11, 2  ;;  %v341_v5 = vand.u32 127, %v340_v4  ;;  %721 = vset.pattern.permute.xlu1 %v840_v11 }
  0x1b   : > { %s320_s15 = scalar_lea.vmem %s1030_s0, %s637_s12  ;;  %s328_s19 = scalar_lea.vmem %s1022_s2, %s639_s16 }
  0x1c   : > { %v337_v1 = vld [vmem:[%s320_s15] sm:$0xff]  ;;  %s324_s8 = scalar_lea.vmem %s1021_s1, %s637_s12  ;;  %s961_s11 = sand.u32 1, %s820_s22  }
  0x1d   : > { %343 = vperm.xlu0 %720, %v337_v1   ;;  %v339_v2 = vld [vmem:[%s328_s19] sm:$0xf]  ;;  %426 = vmatpush.bf16.msra.mxu1 %v655_v18  ;;  %s477_s16 = scalar_lea.hbm %s1026_s6, %s828_s24  ;;  %s316_s17 = scalar_lea.vmem [#allocation4], %s961_s11 }
  0x1e   : > { %v371_v3 = vsel %vm369_vm0, %v339_v2, 0  ;;  %v338_v17 = vld [vmem:[%s324_s8] sm:$0xff]  ;;  %s479_s18 = sshll.u32 %s316_s17, 4  ;;  %s481_s19 = sshll.u32 %s477_s16, 4  ;;  %s480_s18 = int_to_ptr.vmem [resolvable:$true] %s479_s18  ;;  %s482_s19 = int_to_ptr.hbm [resolvable:$true] %s481_s19 }
  0x1f   : > { %380 = vmatpush.bf16.msra.mxu0 %v371_v3  ;;  %s454_s20 = scalar_lea.sflag [#allocation5], %s961_s11  ;;  %s740_s27 = sshra.s32 %s482_s19, 4  ;;  %s741_s27 = int_to_ptr.hbm [resolvable:$true] %s740_s27 }
  0x20   : > { %s742_s28 = scalar_lea.hbm %s741_s27, 1  ;;  %p747_p1 = scmp.lt.s32.totalorder %s741_s27, %s1026_s6 }
  0x21   : > { %p743_p12 = scmp.ne.s32.totalorder %s741_s27, %s742_s28  ;;  %p748_p2 = scmp.lt.s32.totalorder %s746_s13, %s742_s28 }
  0x23   : > { %p744_p13 = pnand %p743_p12, %p916_p4  ;;  %p749_p3 = por %p748_p2, %p747_p1 }
  0x25   : > { %p745_p0 = pneg %p744_p13 }
  0x27   : > { %p750_p5 = pnand %p749_p3, %p745_p0 }
  0x8f   : > { %v344_v6 = vpop.permute.xlu0 %343 }
  0x90   : > { %vm345_vm1 = vcmp.eq.s32.totalorder %v344_v6, %v341_v5 }
  0x91   : > { %v640_v8 = vsel %vm345_vm1, 1.0, %v839_v7 }
  0x92   : > { %v348_v9 = vpack.c.bf16 %v640_v8, %v640_v8 }
  0x94   : > { %349 = vxpose.xlu0.c.b16.start.end [1/1] (short) (narrow) %v348_v9, 16 }
 0x140   : > { %v357_v10 = vpop.trf.xlu0 }
 0x141   : > { %641 = vmatmul.msk.bf16.vlgmr.msra.gmra.mxu0 %vm365_vm2, %v357_v10 }
 0x1be   : > { %v382_v13 = vpop.f32.mrf.mxu0 }
 0x1bf   : > { %v386_v14 = vmax.f32 %v382_v13, 1.0 }
 0x1c1   : > { %724 = vrcp.f32 %v386_v14 }
 0x1c6   : > { %v384_v15 = vpop.f32.mrf.mxu0 }
 0x1c7   : > { %v725_v16 = vpop.eup %724 }
 0x1c8   : > { %390 = vperm.xlu1 %721, %v725_v16  }
 0x1d0   : > { %722 = vset.pattern.permute.xlu1 %v838_v0 }
 0x1d1   : > { %435 = vperm.xlu1 %722, %v338_v17  }
 0x23a   : > { %v391_v19 = vpop.permute.xlu1 %390 }
 0x23b   : > { %v393_v20 = vmul.f32 %v391_v19, %v382_v13 }
 0x23d   : > { %v394_v21 = vpack.c.bf16 %v393_v20, %v393_v20 }
 0x23f   : > { %650 = vmatmul.msk.bf16.vlgmr.msra.gmra.mxu1 %vm415_vm3, %v394_v21 }
 0x243   : > { %v436_v22 = vpop.permute.xlu1 %435 }
 0x244   : > { %v438_v23 = vsel %vm345_vm1, %v436_v22, 0.0 }
 0x245   : > { %v439_v24 = vsel %vm365_vm2, %v438_v23, -inf }
 0x246   : > { %v440_v25 = vrot.slane %v439_v24, 4 }
 0x248   : > { %v441_v26 = vmax.f32 %v439_v24, %v440_v25 }
 0x24a   : > { %v442_v27 = vrot.slane %v441_v26, 2 }
 0x24c   : > { %v443_v28 = vmax.f32 %v441_v26, %v442_v27 }
 0x24e   : > { %v444_v29 = vrot.slane %v443_v28, 1 }
 0x250   : > { %v445_v30 = vmax.f32 %v443_v28, %v444_v29 }
 0x252   : > { %447 = vst.msk [vmem:[%s316_s17] sm:$0x1] %vm446_vm4, %v445_v30 }
 0x253   : > { %753 = shalt.err (!%p750_p5)
}
 0x254   : > { %658 = dma.vmem_to_hbm [thread:$0]  (%p916_p4), %s480_s18, 16, %s482_s19, %s454_s20   ;;  %v723_v31 = vld [vmem:[%s1024_s4] ss:$0 sm:$0xff] }
 0x255   : > { %s652_s15 = sshll.u32 %s828_s24, 3  ;;  %s636_s16 = sshll.u32 %s961_s11, 3 }
 0x256   : > { %s464_s30 = scalar_lea.hbm %s1025_s5, %s652_s15  ;;  %s310_s27 = scalar_lea.vmem [#allocation2], %s636_s16 }
 0x257   : > { %s466_s28 = sshll.u32 %s310_s27, 4  ;;  %s468_s13 = sshll.u32 %s464_s30, 4  ;;  %s467_s28 = int_to_ptr.vmem [resolvable:$true] %s466_s28  ;;  %s469_s13 = int_to_ptr.hbm [resolvable:$true] %s468_s13 }
 0x258   : > { %s449_s18 = scalar_lea.sflag [#allocation3], %s961_s11  ;;  %s768_s24 = sshra.s32 %s469_s13, 4  ;;  %s769_s24 = int_to_ptr.hbm [resolvable:$true] %s768_s24 }
 0x259   : > { %s770_s19 = scalar_lea.hbm %s769_s24, 8  ;;  %s774_s12 = scalar_lea.hbm %s1025_s5, 16 }
 0x25a   : > { %p771_p6 = scmp.ne.s32.totalorder %s769_s24, %s770_s19  ;;  %p775_p10 = scmp.lt.s32.totalorder %s769_s24, %s1025_s5 }
 0x25b   : > { %p776_p11 = scmp.lt.s32.totalorder %s774_s12, %s770_s19 }
 0x25c   : > { %p772_p7 = pnand %p771_p6, %p916_p4 }
 0x25d   : > { %p777_p12 = por %p776_p11, %p775_p10 }
 0x25e   : > { %p773_p9 = pneg %p772_p7 }
 0x260   : > { %p778_p13 = pnand %p777_p12, %p773_p9 }
 0x2bc   : > { %v428_v32 = vpop.f32.mrf.mxu1 }
 0x2bd   : > { %v429_v33 = vadd.f32 %v723_v31, %v428_v32 }
 0x2bf   : > { %432 = vst [vmem:[%s310_s27] sm:$0xff] %v429_v33 }
 0x2c0   : > { %781 = shalt.err (!%p778_p13)
}
 0x2c1   : > { %657 = dma.vmem_to_hbm [thread:$0]  (%p916_p4), %s467_s28, 128, %s469_s13, %s449_s18  }
 0x2c4   : > { %v430_v34 = vpop.f32.mrf.mxu1 }
 0x2c5 PF: > { %p668_p0 = scmp.ge.s32.totalorder %s836_s26, 2  ;;  %s493_s11 = sand.u32 1, %s816_s21  }
 0x2c6   : > { %s494_s17 = scalar_lea.sflag [#allocation3], %s493_s11 }
 0x2c7   : > { %p662_p1 = pnand %p668_p0, %p923_p8 }
 0x2c9   : > { %p663_p2 = pneg %p662_p1 }
 0x2cb   : > { %807 = dma.done.wait (%p663_p2), %s494_s17, 128  }
 0x2cc   : > { %809 = vsyncadd (%p663_p2), %s494_s17, 4294967168  ;;  %s504_s30 = scalar_lea.sflag [#allocation5], %s493_s11 }
 0x2cd   : > { %811 = dma.done.wait (%p663_p2), %s504_s30, 16  }
 0x2ce   : > { %813 = vsyncadd (%p663_p2), %s504_s30, 4294967280  ;;  %s23_s26 = sadd.s32 1, %s836_s26   ;;  %s1031_s21 = smov %s820_s22 }
 0x2cf   : > { %p20_p3 = scmp.ge.s32.totalorder %s23_s26, 4   ;;  %s1032_s22 = smov %s824_s23 }
 0x2d0   : > { %s1033_s23 = smov %s929_s10  ;;  %s1034_s24 = smov %s832_s25 }
 0x2d1   : > { %s1035_s25 = smov %s1037_s29  ;;  %22 = sbr.rel (!%p20_p3) target bundleno = 8 (0x8), region = 104 }
 0x2d6   :  { %509 = vsyncpa [#allocation3], 1 }
 0x2d7   :  { %511 = vsyncpa [#allocation3 + $0x1], 1 }
 0x2d8   :  { %512 = vsyncpa [#allocation5], 1 }
 0x2d9   :  { %514 = vsyncpa [#allocation5 + $0x1], 1 }

</bundles_post_ra>
